<compile_context>
chip_gen: v5e
topology: v5e:2x2
jax: 0.10.0
libtpu: 0.0.40
codegen_flags: <defaults>
</compile_context>

<pallas_src>
import functools
import numpy as np
import jax
import jax.numpy as jnp
from jax.experimental import pallas as pl
from jax.experimental.pallas import tpu as pltpu

F32 = jnp.float32
BF16 = jnp.bfloat16
LANE = 128
_VMEM_LIMIT = 32 * 1024 * 1024


# ----------------------------------------------------------------------------- helpers
def _round_up(n, m):
    return ((n + m - 1) // m) * m


def _row_tile(p):
    # 256-row tiles when there is enough work, otherwise a single 8-aligned tile.
    return 256 if p >= 256 else _round_up(p, 8)


def _pick_col_tile(k_pad):
    if k_pad <= 512:
        return k_pad
    for tk in (512, 384, 256, 128):
        if k_pad % tk == 0:
            return tk
    return 128


def _pad2d(x, rows, cols):
    return jnp.pad(x, ((0, rows - x.shape[0]), (0, cols - x.shape[1])))


def _fs(shape):
    """Full-array BlockSpec for a grid of (1,)."""
    return pl.BlockSpec(shape, lambda *_: (0,) * len(shape))


def _im2col_from_padded(xp, K):
    """xp: already-padded (Dp,Hp,Wp,C).  Returns (P, K^3*C) and output dims."""
    Dp, Hp, Wp, C = xp.shape
    D, H, W = Dp - K + 1, Hp - K + 1, Wp - K + 1
    cols = []
    for kd in range(K):
        for kh in range(K):
            for kw in range(K):
                cols.append(xp[kd:kd + D, kh:kh + H, kw:kw + W, :])
    col = jnp.stack(cols, axis=3)                       # (D,H,W,K^3,C)
    return col.reshape(D * H * W, K ** 3 * C), (D, H, W)


# ----------------------------------------------------------------------- GEMM + bias kernel
def _gemm_bias_kernel(x_ref, w_ref, b_ref, o_ref, acc_ref):
    k = pl.program_id(1)

    @pl.when(k == 0)
    def _():
        acc_ref[...] = jnp.zeros_like(acc_ref)

    acc_ref[...] += jnp.dot(x_ref[...], w_ref[...], preferred_element_type=jnp.float32)

    @pl.when(k == pl.num_programs(1) - 1)
    def _():
        o_ref[...] = acc_ref[...] + b_ref[...]


def _gemm_bias(col, w_col, bias):
    """col: (P,K) f32, w_col: (K,Cout) f32, bias: (Cout,).  Returns padded (P_pad, N_pad) f32."""
    P, K = col.shape
    Cout = w_col.shape[1]
    N_pad = _round_up(Cout, LANE)
    K_pad = _round_up(K, LANE)
    TK = _pick_col_tile(K_pad)
    TP = _row_tile(P)
    P_pad = _round_up(P, TP)
    x = _pad2d(col, P_pad, K_pad).astype(BF16)
    w = _pad2d(w_col, K_pad, N_pad).astype(BF16)
    b = _pad2d(bias[None, :].astype(F32), 1, N_pad)
    out = pl.pallas_call(
        _gemm_bias_kernel,
        out_shape=jax.ShapeDtypeStruct((P_pad, N_pad), F32),
        grid=(P_pad // TP, K_pad // TK),
        in_specs=[pl.BlockSpec((TP, TK), lambda i, k: (i, k)),
                  pl.BlockSpec((TK, N_pad), lambda i, k: (k, 0)),
                  pl.BlockSpec((1, N_pad), lambda i, k: (0, 0))],
        out_specs=pl.BlockSpec((TP, N_pad), lambda i, k: (i, 0)),
        scratch_shapes=[pltpu.VMEM((TP, N_pad), F32)],
        compiler_params=pltpu.CompilerParams(
            dimension_semantics=("parallel", "arbitrary"),
            vmem_limit_bytes=_VMEM_LIMIT),
    )(x, w, b)
    return out, P_pad, N_pad


# ------------------------------------------------------------- BatchNorm (batch stats) + ReLU
def _bn_stats_kernel(x_ref, o_ref, sum_sc, sq_sc, *, valid_rows, tile_rows):
    i = pl.program_id(0)

    @pl.when(i == 0)
    def _():
        sum_sc[...] = jnp.zeros_like(sum_sc)
        sq_sc[...] = jnp.zeros_like(sq_sc)

    x = x_ref[...]
    rows = i * tile_rows + jax.lax.broadcasted_iota(jnp.int32, x.shape, 0)
    xm = jnp.where(rows < valid_rows, x, 0.0)
    sum_sc[...] += jnp.sum(xm, axis=0, keepdims=True)
    sq_sc[...] += jnp.sum(xm * xm, axis=0, keepdims=True)

    @pl.when(i == pl.num_programs(0) - 1)
    def _():
        inv_n = 1.0 / float(valid_rows)
        mean = sum_sc[...] * inv_n
        var = sq_sc[...] * inv_n - mean * mean
        o_ref[...] = jnp.concatenate([mean, var], axis=0)


def _bn_relu_kernel(x_ref, stats_ref, g_ref, b_ref, o_ref):
    mean = stats_ref[0:1, :]
    var = stats_ref[1:2, :]
    y = (x_ref[...] - mean) * jax.lax.rsqrt(var + 1e-5) * g_ref[...] + b_ref[...]
    o_ref[...] = jnp.maximum(y, 0.0)


def _batchnorm_relu(y, P, gamma, beta):
    """y: (P_pad, N_pad) conv+bias output; stats over the P valid rows (exact, not per-tile)."""
    P_pad, N_pad = y.shape
    TP = _row_tile(P)
    g = _pad2d(gamma[None, :].astype(F32), 1, N_pad)
    b = _pad2d(beta[None, :].astype(F32), 1, N_pad)
    stats = pl.pallas_call(
        functools.partial(_bn_stats_kernel, valid_rows=P, tile_rows=TP),
        out_shape=jax.ShapeDtypeStruct((2, N_pad), F32),
        grid=(P_pad // TP,),
        in_specs=[pl.BlockSpec((TP, N_pad), lambda i: (i, 0))],
        out_specs=pl.BlockSpec((2, N_pad), lambda i: (0, 0)),
        scratch_shapes=[pltpu.VMEM((1, N_pad), F32), pltpu.VMEM((1, N_pad), F32)],
        compiler_params=pltpu.CompilerParams(
            dimension_semantics=("arbitrary",), vmem_limit_bytes=_VMEM_LIMIT),
    )(y)
    out = pl.pallas_call(
        _bn_relu_kernel,
        out_shape=jax.ShapeDtypeStruct((P_pad, N_pad), F32),
        grid=(P_pad // TP,),
        in_specs=[pl.BlockSpec((TP, N_pad), lambda i: (i, 0)),
                  pl.BlockSpec((2, N_pad), lambda i: (0, 0)),
                  pl.BlockSpec((1, N_pad), lambda i: (0, 0)),
                  pl.BlockSpec((1, N_pad), lambda i: (0, 0))],
        out_specs=pl.BlockSpec((TP, N_pad), lambda i: (i, 0)),
        compiler_params=pltpu.CompilerParams(
            dimension_semantics=("parallel",), vmem_limit_bytes=_VMEM_LIMIT),
    )(y, stats, g, b)
    return out


# --------------------------------------------------------------------------- conv via GEMM
def _conv3d_gemm(x_padded, w_torch, bias, gamma=None, beta=None, bn_relu=False):
    """x_padded: (Dp,Hp,Wp,Cin) already spatially padded.  w_torch: (Cout,Cin,K,K,K)."""
    K = w_torch.shape[2]
    Cout = w_torch.shape[0]
    # TODO(synk): im2col is still materialized in XLA/HBM; folding the K^3 taps into the GEMM
    # kernel (pl.ds windows over the padded volume) would remove the 27x/125x HBM blow-up at
    # larger resolutions.
    col, dims = _im2col_from_padded(x_padded, K)
    w_col = jnp.transpose(w_torch, (2, 3, 4, 1, 0)).reshape(-1, Cout)
    P = col.shape[0]
    y, _, _ = _gemm_bias(col, w_col, bias)
    if bn_relu:
        y = _batchnorm_relu(y, P, gamma, beta)
    return y[:P, :Cout].reshape(*dims, Cout)


# ------------------------------------------------------------------ trilinear sampling kernel
def _trilerp_ws_kernel(c_ref, w_ref, o_ref):
    acc = w_ref[:, 0:1] * c_ref[0]
    for k in range(1, 8):
        acc = acc + w_ref[:, k:k + 1] * c_ref[k]
    o_ref[...] = acc


def _trilerp(grid_flat, idx, w):
    """grid_flat: (Ncells, C).  idx/w: (M, 8) corner ids / trilinear weights.  Returns (M, C)."""
    M = idx.shape[0]
    Ncells, C = grid_flat.shape
    C_pad = _round_up(C, LANE)
    TM = LANE if M >= LANE else _round_up(M, 8)
    M_pad = _round_up(M, TM)
    g = _pad2d(grid_flat, Ncells, C_pad)
    idx_p = jnp.pad(idx, ((0, M_pad - M), (0, 0)))
    w_p = jnp.pad(w, ((0, M_pad - M), (0, 0)))
    # TODO(synk): the 8-corner row gather runs in XLA (jnp.take); only the weighted reduction
    # is fused in Pallas (replaces the old O(M*Ncells) one-hot matmul).
    corners = jnp.take(g, jnp.transpose(idx_p), axis=0)          # (8, M_pad, C_pad)
    out = pl.pallas_call(
        _trilerp_ws_kernel,
        out_shape=jax.ShapeDtypeStruct((M_pad, C_pad), F32),
        grid=(M_pad // TM,),
        in_specs=[pl.BlockSpec((8, TM, C_pad), lambda i: (0, i, 0)),
                  pl.BlockSpec((TM, 8), lambda i: (i, 0))],
        out_specs=pl.BlockSpec((TM, C_pad), lambda i: (i, 0)),
        compiler_params=pltpu.CompilerParams(
            dimension_semantics=("parallel",), vmem_limit_bytes=_VMEM_LIMIT),
    )(corners, w_p)
    return out[:M, :C]


# --------------------------------------------------------------------------- directional MLP
def _mlp_kernel(x_ref, w1, b1, w2, b2, w3, b3, w4, b4, o_ref):
    def layer(h, w_r, b_r, relu):
        y = jnp.dot(h, w_r[...], preferred_element_type=jnp.float32) + b_r[...]
        return jnp.maximum(y, 0.0) if relu else y

    h = layer(x_ref[...], w1, b1, True).astype(BF16)
    h = layer(h, w2, b2, True).astype(BF16)
    h = layer(h, w3, b3, True).astype(BF16)
    o_ref[...] = layer(h, w4, b4, False)


def _directional_mlp(x, p):
    M, D0 = x.shape
    H = LANE                                   # hidden (64) padded to lane width
    D0_pad = _round_up(D0, LANE)
    TM = LANE if M >= LANE else _round_up(M, 8)
    M_pad = _round_up(M, TM)
    x_p = _pad2d(x, M_pad, D0_pad).astype(BF16)
    w1 = _pad2d(p['mlp_w1'], D0_pad, H).astype(BF16)
    w2 = _pad2d(p['mlp_w2'], H, H).astype(BF16)
    w3 = _pad2d(p['mlp_w3'], H, H).astype(BF16)
    w4 = _pad2d(p['mlp_w4'], H, H).astype(BF16)
    b1 = _pad2d(p['mlp_b1'][None], 1, H)
    b2 = _pad2d(p['mlp_b2'][None], 1, H)
    b3 = _pad2d(p['mlp_b3'][None], 1, H)
    b4 = _pad2d(p['mlp_b4'][None], 1, H)
    full = lambda s: pl.BlockSpec(s, lambda i: (0, 0))
    out = pl.pallas_call(
        _mlp_kernel,
        out_shape=jax.ShapeDtypeStruct((M_pad, H), F32),
        grid=(M_pad // TM,),
        in_specs=[pl.BlockSpec((TM, D0_pad), lambda i: (i, 0)),
                  full((D0_pad, H)), full((1, H)),
                  full((H, H)), full((1, H)),
                  full((H, H)), full((1, H)),
                  full((H, H)), full((1, H))],
        out_specs=pl.BlockSpec((TM, H), lambda i: (i, 0)),
        compiler_params=pltpu.CompilerParams(
            dimension_semantics=("parallel",), vmem_limit_bytes=_VMEM_LIMIT),
    )(x_p, w1, b1, w2, b2, w3, b3, w4, b4)
    return out[:M, :3]


# ---------------------------------------------------------------------------- volume render
def _volrender_kernel(scale_ref, sdf_ref, chan_ref, o_ref):
    scale = scale_ref[...]                                   # (1,1)
    sdf = sdf_ref[...]                                       # (B, S)
    sd = 1.0 / (1.0 + jnp.exp(-sdf * scale))                 # logistic CDF
    alpha = jnp.clip((sd[:, :-1] - sd[:, 1:]) / (sd[:, :-1] + 1e-10), 0.0)
    B, Sm1 = alpha.shape
    # exclusive cumprod of (1 - alpha) along the sample axis, vectorized via a strictly
    # upper-triangular matmul in log space (no per-sample Python loop).
    log_om = jnp.log(jnp.maximum(1.0 - alpha, 1e-30))
    r = jax.lax.broadcasted_iota(jnp.int32, (Sm1, Sm1), 0)
    c = jax.lax.broadcasted_iota(jnp.int32, (Sm1, Sm1), 1)
    upper = (r < c).astype(jnp.float32)
    trans = jnp.exp(jnp.dot(log_om, upper, preferred_element_type=jnp.float32))
    weights = trans * alpha                                  # (B, S-1)
    r_out = jnp.sum(weights * chan_ref[0], axis=1, keepdims=True)
    g_out = jnp.sum(weights * chan_ref[1], axis=1, keepdims=True)
    b_out = jnp.sum(weights * chan_ref[2], axis=1, keepdims=True)
    d_out = jnp.sum(weights * chan_ref[3], axis=1, keepdims=True)
    pad = jnp.zeros((B, o_ref.shape[1] - 4), jnp.float32)
    o_ref[...] = jnp.concatenate([r_out, g_out, b_out, d_out, pad], axis=1)


def _volume_render(scale, sdfs, rgbs, dists):
    B, S = sdfs.shape
    # per-channel (B, S-1) layout (no narrow channel-first lane dim)
    chan = jnp.concatenate(
        [jnp.transpose(rgbs[:, :-1, :], (2, 0, 1)), dists[None]], axis=0)   # (4,B,S-1)
    out = pl.pallas_call(
        _volrender_kernel,
        out_shape=jax.ShapeDtypeStruct((B, LANE), F32),      # lane-dense output slab
        grid=(1,),
        in_specs=[_fs((1, 1)), _fs((B, S)), _fs((4, B, S - 1))],
        out_specs=_fs((B, LANE)),
        compiler_params=pltpu.CompilerParams(
            dimension_semantics=("arbitrary",), vmem_limit_bytes=_VMEM_LIMIT),
    )(scale, sdfs, chan)
    return out[:, 0:3], out[:, 3]


# ------------------------------------------------------------------------- model pieces
def _implicit_forward(p):
    """ImplicitNetwork._forward(): conv1->cat->conv2->cat->convT3, density/feature/sobel grads."""
    g = p['grid']                                            # (R,R,R,latent)
    R = g.shape[0]
    x1 = _conv3d_gemm(jnp.pad(g, ((1, 1), (1, 1), (1, 1), (0, 0))),
                      p['conv1_w'], p['conv1_b'], p['bn1_g'], p['bn1_b'], bn_relu=True)
    x = jnp.concatenate([g, x1], axis=-1)
    x2 = _conv3d_gemm(jnp.pad(x, ((1, 1), (1, 1), (1, 1), (0, 0))),
                      p['conv2_w'], p['conv2_b'], p['bn2_g'], p['bn2_b'], bn_relu=True)
    x = jnp.concatenate([x, x2], axis=-1)                    # (R,R,R,140)
    # ConvTranspose3d(k=3,s=2,p=1,op=1) == conv3d(dilated+pad(1,2) input, flipped weights)
    Cin = x.shape[-1]
    xd = jnp.zeros((2 * R - 1, 2 * R - 1, 2 * R - 1, Cin), F32).at[::2, ::2, ::2, :].set(x)
    xdp = jnp.pad(xd, ((1, 2), (1, 2), (1, 2), (0, 0)))
    w3_eq = jnp.transpose(jnp.flip(p['conv3_w'], axis=(2, 3, 4)), (1, 0, 2, 3, 4))
    x3 = _conv3d_gemm(xdp, w3_eq, p['conv3_b'])              # (2R,2R,2R,1+rgb_latent)
    density = x3[..., :1]
    feature = x3[..., 1:]
    # gradients = conv3d(density, sobel(3,1,5,5,5), padding=2)
    grads = _conv3d_gemm(jnp.pad(density, ((2, 2), (2, 2), (2, 2), (0, 0))),
                         p['sobel'], jnp.zeros((3,), F32))
    return density, feature, grads


def _trilinear_corner_info(pts, xyz_min, xyz_max, size):
    """Corner flat indices (M,8) and trilinear weights (M,8) matching F.grid_sample
    (align_corners=True) after the .flip(-1) coordinate convention of grid_sampler."""
    n = jnp.clip((pts - xyz_min) / (xyz_max - xyz_min), 0.0, 1.0)
    f = n * (size - 1)
    i0 = jnp.clip(jnp.floor(f), 0, size - 2).astype(jnp.int32)
    frac = f - i0.astype(F32)
    i1 = i0 + 1
    fx, fy, fz = frac[:, 0], frac[:, 1], frac[:, 2]
    HW = size * size
    idxs, ws = [], []
    for wx, ix in ((1.0 - fx, i0[:, 0]), (fx, i1[:, 0])):
        for wy, iy in ((1.0 - fy, i0[:, 1]), (fy, i1[:, 1])):
            for wz, iz in ((1.0 - fz, i0[:, 2]), (fz, i1[:, 2])):
                idxs.append(ix * HW + iy * size + iz)
                ws.append(wx * wy * wz)
    return jnp.stack(idxs, axis=1), jnp.stack(ws, axis=1).astype(F32)


def _embed_dirs(d):
    """get_embedder(multires=6, include_inputs=True): [x, sin(2^i x), cos(2^i x)] -> 39 dims."""
    outs = [d]
    for i in range(6):
        freq = 2.0 ** i
        outs.append(jnp.sin(d * freq))
        outs.append(jnp.cos(d * freq))
    return jnp.concatenate(outs, axis=-1)


def single_scale_neus_forward(p, rays_o, rays_d, viewdirs, near, far, stepsize):
    xyz_min, xyz_max = p['xyz_min'], p['xyz_max']
    R = p['grid'].shape[0]
    voxel_size = (jnp.prod(xyz_max - xyz_min) / (R ** 3)) ** (1.0 / 3.0)

    # ---- sample_ray (glue, elementwise) ----
    N_samples = int(np.linalg.norm(np.array([R + 1] * 3)) / stepsize) + 1
    vec = jnp.where(rays_d == 0, jnp.full_like(rays_d, 1e-6), rays_d)
    rate_a = (xyz_max - rays_o) / vec
    rate_b = (xyz_min - rays_o) / vec
    t_min = jnp.clip(jnp.minimum(rate_a, rate_b).max(-1), near, far)
    t_max = jnp.clip(jnp.maximum(rate_a, rate_b).min(-1), near, far)
    mask_ray = t_max <= t_min
    rng = jnp.arange(N_samples, dtype=F32)[None]
    step = stepsize * voxel_size * rng
    interpx = t_min[:, None] + step / jnp.linalg.norm(rays_d, axis=-1, keepdims=True)
    ray_pts = rays_o[:, None, :] + rays_d[:, None, :] * interpx[..., None]          # (B,S,3)
    mask_outbox = mask_ray[:, None] | jnp.any((xyz_min > ray_pts) | (ray_pts > xyz_max), -1)
    B, S, _ = ray_pts.shape

    # ---- implicit network (tiled Pallas GEMM / BN / ReLU kernels) ----
    density, feature, grads = _implicit_forward(p)
    size = density.shape[0]
    grid_all = jnp.concatenate([density, feature, grads], axis=-1)                   # (.., 19)
    C = grid_all.shape[-1]
    grid_flat = grid_all.reshape(size ** 3, C)

    # ---- trilinear grid sampling (XLA corner gather + Pallas weighted sum) ----
    # TODO(synk): PyTorch uses boolean-mask compaction ray_pts[~mask_outbox]; with static
    # shapes we compute densely for all samples and mask afterwards (identical results).
    pts_flat = ray_pts.reshape(-1, 3)
    M = pts_flat.shape[0]
    idx, w = _trilinear_corner_info(pts_flat, xyz_min, xyz_max, size)
    sampled = _trilerp(grid_flat, idx, w)
    sdf_s = sampled[:, 0]
    feat_s = sampled[:, 1:1 + feature.shape[-1]]
    grad_s = sampled[:, 1 + feature.shape[-1]:]

    # ---- directional head (glue) + fused MLP (Pallas) ----
    vdir = jnp.broadcast_to(viewdirs[:, None, :], (B, S, 3)).reshape(-1, 3)
    nrm = jnp.linalg.norm(grad_s, axis=-1, keepdims=True)
    normals = grad_s / jnp.maximum(nrm, 1e-12)
    dotp = jnp.sum(-vdir * normals, axis=-1, keepdims=True)
    refdirs = 2.0 * dotp * normals + vdir
    rgb_in = jnp.concatenate([feat_s, dotp, _embed_dirs(refdirs), pts_flat], axis=-1)  # (M,58)
    rgb_out = _directional_mlp(rgb_in, p)

    mask_flat = mask_outbox.reshape(-1)
    sdfs = jnp.where(mask_flat, 100.0, sdf_s).reshape(B, S)
    rgbs = jnp.where(mask_flat[:, None], 0.0, rgb_out).reshape(B, S, 3)

    # ---- volume rendering + compositing (vectorized Pallas kernel) ----
    distances = jnp.linalg.norm(rays_o[:, None, :] - ray_pts[:, :-1, :], axis=-1)     # (B,S-1)
    scale = jnp.exp(p['variance'] * 10.0).reshape(1, 1)
    rgb, depth = _volume_render(scale, sdfs, rgbs, distances)
    return {'rgb': rgb, 'depth': depth}


# ----------------------------------------------------------------------------- params
def init_params(key, resolution=4, latent_dim=12, rgb_latent_dim=15):
    feat_ch = 1 + rgb_latent_dim
    keys = jax.random.split(key, 16)

    def rnd(k, shape, s=0.1):
        return (s * jax.random.normal(k, shape)).astype(F32)

    p = {
        'xyz_min': jnp.array([-1.0, -1.0, -1.0], F32),
        'xyz_max': jnp.array([1.0, 1.0, 1.0], F32),
        # torch grid is (1, latent, R, R, R); stored channels-last with N dropped
        'grid': rnd(keys[0], (resolution, resolution, resolution, latent_dim)),
        'conv1_w': rnd(keys[1], (64, latent_dim, 3, 3, 3)),
        'conv1_b': rnd(keys[2], (64,), 0.01),
        'bn1_g': jnp.ones((64,), F32), 'bn1_b': jnp.zeros((64,), F32),
        'conv2_w': rnd(keys[3], (64, 64 + latent_dim, 3, 3, 3)),
        'conv2_b': rnd(keys[4], (64,), 0.01),
        'bn2_g': jnp.ones((64,), F32), 'bn2_b': jnp.zeros((64,), F32),
        # ConvTranspose3d weight layout: (Cin, Cout, k, k, k)
        'conv3_w': rnd(keys[5], (64 * 2 + latent_dim, feat_ch, 3, 3, 3)),
        'conv3_b': rnd(keys[6], (feat_ch,), 0.01),
        'variance': jnp.asarray(0.1, F32),
    }
    # sobel kernel == cv2.getDerivKernels(1, 0, 5, normalize=True)
    h_dash = np.array([-1., -2., 0., 2., 1.], np.float32) / 8.0
    h = np.array([1., 4., 6., 4., 1.], np.float32) / 16.0
    kx = np.einsum('i,j,k->ijk', h_dash, h, h)
    ky = np.einsum('i,j,k->ijk', h, h_dash, h)
    kz = np.einsum('i,j,k->ijk', h, h, h_dash)
    p['sobel'] = jnp.asarray(np.stack([kx, ky, kz])[:, None], F32)        # (3,1,5,5,5)
    # directional MLP: dim0 = rgb_latent(15) + embed(39) + 4 = 58
    dim0 = rgb_latent_dim + (3 + 3 * 2 * 6) + 4
    p['mlp_w1'] = rnd(keys[7], (dim0, 64)); p['mlp_b1'] = rnd(keys[8], (64,), 0.01)
    p['mlp_w2'] = rnd(keys[9], (64, 64));   p['mlp_b2'] = rnd(keys[10], (64,), 0.01)
    p['mlp_w3'] = rnd(keys[11], (64, 64));  p['mlp_b3'] = rnd(keys[12], (64,), 0.01)
    p['mlp_w4'] = rnd(keys[13], (64, 3));   p['mlp_b4'] = rnd(keys[14], (3,), 0.01)
    return p


# ------------------------------------------------------------------------------- main
if __name__ == "__main__":
    params = init_params(jax.random.PRNGKey(0), resolution=4, latent_dim=12, rgb_latent_dim=15)

    B = 2
    kro, krd = jax.random.split(jax.random.PRNGKey(0))
    rays_o = (jnp.array([[0.0, 0.0, -2.5], [0.3, -0.2, -2.5]], F32)
              + 0.01 * jax.random.normal(kro, (B, 3), F32))
    rays_d = (jnp.array([[0.0, 0.0, 1.0], [-0.1, 0.05, 1.0]], F32)
              + 0.01 * jax.random.normal(krd, (B, 3), F32))
    viewdirs = rays_d / jnp.linalg.norm(rays_d, axis=-1, keepdims=True)

    out = single_scale_neus_forward(params, rays_o, rays_d, viewdirs,
                                    near=0.2, far=6.0, stepsize=0.5)
    jax.block_until_ready(out)
    assert out['rgb'].shape == (B, 3) and out['depth'].shape == (B,)
    print("KERNEL_OK")
</pallas_src>

<mosaic_0001>
module attributes {stable_mosaic.version = 11 : i64} {
  func.func @_gemm_bias_kernel(%arg0: i32, %arg1: i32, %arg2: memref<64x384xbf16, #tpu.memory_space<vmem>>, %arg3: memref<384x128xbf16, #tpu.memory_space<vmem>>, %arg4: memref<1x128xf32, #tpu.memory_space<vmem>>, %arg5: memref<64x128xf32, #tpu.memory_space<vmem>>, %arg6: memref<64x128xf32, #tpu.memory_space<vmem>>) attributes {dimension_semantics = [#tpu.dimension_semantics<parallel>, #tpu.dimension_semantics<arbitrary>], iteration_bounds = array<i64: 1, 1>, scalar_prefetch = 0 : i64, scratch_operands = 1 : i64, tpu.core_type = #tpu.core_type<tc>, window_params = [{transform_indices = @transform_0, window_bounds = array<i64: 64, 384>}, {transform_indices = @transform_1, window_bounds = array<i64: 384, 128>}, {pipeline_mode = #tpu.pipeline_mode<synchronous>, transform_indices = @transform_2, window_bounds = array<i64: 1, 128>}, {transform_indices = @transform_3, window_bounds = array<i64: 64, 128>}]} {
    %c0_i32 = arith.constant 0 : i32
    %0 = arith.cmpi eq, %arg1, %c0_i32 : i32
    %1 = arith.extui %0 : i1 to i32
    %c0_i32_0 = arith.constant 0 : i32
    %2 = arith.cmpi ne, %1, %c0_i32_0 : i32
    scf.if %2 {
      %cst_10 = arith.constant 0.000000e+00 : f32
      %12 = vector.broadcast %cst_10 : f32 to vector<64x128xf32>
      %c0_11 = arith.constant 0 : index
      %c0_12 = arith.constant 0 : index
      %13 = vector.load %arg6[%c0_11, %c0_12] : memref<64x128xf32, #tpu.memory_space<vmem>>, vector<64x128xf32>
      tpu.vector_store %arg6[%c0_11, %c0_12], %12 {strides = array<i32>} : memref<64x128xf32, #tpu.memory_space<vmem>>, vector<64x128xf32>,
    } else {
    }
    %c0 = arith.constant 0 : index
    %c0_1 = arith.constant 0 : index
    %3 = vector.load %arg6[%c0, %c0_1] : memref<64x128xf32, #tpu.memory_space<vmem>>, vector<64x128xf32>
    %c0_2 = arith.constant 0 : index
    %c0_3 = arith.constant 0 : index
    %4 = vector.load %arg2[%c0_2, %c0_3] : memref<64x384xbf16, #tpu.memory_space<vmem>>, vector<64x384xbf16>
    %c0_4 = arith.constant 0 : index
    %c0_5 = arith.constant 0 : index
    %5 = vector.load %arg3[%c0_4, %c0_5] : memref<384x128xbf16, #tpu.memory_space<vmem>>, vector<384x128xbf16>
    %cst = arith.constant dense<0.000000e+00> : vector<64x128xf32>
    %6 = tpu.matmul %4, %5, %cst {dimension_numbers = #tpu.dot_dimension_numbers<[1], [0], [0], [1], [0, 0, 1, 1], [], []>} : vector<64x384xbf16>, vector<384x128xbf16>, vector<64x128xf32> -> vector<64x128xf32>
    %7 = arith.addf %3, %6 : vector<64x128xf32>
    %c0_6 = arith.constant 0 : index
    %c0_7 = arith.constant 0 : index
    %8 = vector.load %arg6[%c0_6, %c0_7] : memref<64x128xf32, #tpu.memory_space<vmem>>, vector<64x128xf32>
    tpu.vector_store %arg6[%c0_6, %c0_7], %7 {strides = array<i32>} : memref<64x128xf32, #tpu.memory_space<vmem>>, vector<64x128xf32>,
    %c0_i32_8 = arith.constant 0 : i32
    %9 = arith.cmpi eq, %arg1, %c0_i32_8 : i32
    %10 = arith.extui %9 : i1 to i32
    %c0_i32_9 = arith.constant 0 : i32
    %11 = arith.cmpi ne, %10, %c0_i32_9 : i32
    scf.if %11 {
      %c0_10 = arith.constant 0 : index
      %c0_11 = arith.constant 0 : index
      %12 = vector.load %arg6[%c0_10, %c0_11] : memref<64x128xf32, #tpu.memory_space<vmem>>, vector<64x128xf32>
      %c0_12 = arith.constant 0 : index
      %c0_13 = arith.constant 0 : index
      %13 = vector.load %arg4[%c0_12, %c0_13] : memref<1x128xf32, #tpu.memory_space<vmem>>, vector<1x128xf32>
      %14 = vector.broadcast %13 : vector<1x128xf32> to vector<64x128xf32>
      %15 = arith.addf %12, %14 : vector<64x128xf32>
      %c0_14 = arith.constant 0 : index
      %c0_15 = arith.constant 0 : index
      %16 = vector.load %arg5[%c0_14, %c0_15] : memref<64x128xf32, #tpu.memory_space<vmem>>, vector<64x128xf32>
      tpu.vector_store %arg5[%c0_14, %c0_15], %15 {strides = array<i32>} : memref<64x128xf32, #tpu.memory_space<vmem>>, vector<64x128xf32>,
    } else {
    }
    return
  }
  func.func @transform_0(%arg0: i32, %arg1: i32) -> (i32, i32) {
    %c0_i32 = arith.constant 0 : i32
    return %arg0, %arg1 : i32, i32
  }
  func.func @transform_1(%arg0: i32, %arg1: i32) -> (i32, i32) {
    %c0_i32 = arith.constant 0 : i32
    %c0_i32_0 = arith.constant 0 : i32
    return %arg1, %c0_i32 : i32, i32
  }
  func.func @transform_2(%arg0: i32, %arg1: i32) -> (i32, i32) {
    %c0_i32 = arith.constant 0 : i32
    %c0_i32_0 = arith.constant 0 : i32
    %c0_i32_1 = arith.constant 0 : i32
    return %c0_i32, %c0_i32_0 : i32, i32
  }
  func.func @transform_3(%arg0: i32, %arg1: i32) -> (i32, i32) {
    %c0_i32 = arith.constant 0 : i32
    %c0_i32_0 = arith.constant 0 : i32
    return %arg0, %c0_i32 : i32, i32
  }
}

</mosaic_0001>

<bundles_post_ra>
// kernel: tpu_custom_call.1
= control target key start
LH: loop header
LB: loop body
LE: loop exit
PB: predicated region body
PF: predicated region fallthrough
CT: control target
= control target key end

     0   :  { %8 = vsyncpa [#allocation4], 0  ;;  %s810_s0 = inlined_call_operand.hbm [shape: bf16[64,384], index: 0, kind: input, shape index: {}]   ;;  %s811_s1 = inlined_call_operand.hbm [shape: bf16[384,128], index: 1, kind: input, shape index: {}]   ;;  %s812_s2 = inlined_call_operand.vmem [shape: f32[1,128], index: 2, kind: input, shape index: {}]   ;;  %s813_s3 = inlined_call_operand.hbm [shape: f32[64,128], index: 3, kind: output, shape index: {}]  }
   0x1   :  { %9 = vsyncpa [#allocation7], 0 }
   0x2   :  { %10 = vsyncpa [#allocation5], 0  ;;  %s15_s14 = sshll.u32 %s810_s0, 4  ;;  %s769_s15 = smov [#allocation3]   ;;  %s16_s14 = int_to_ptr.hbm [resolvable:$true] %s15_s14 }
   0x3   :  { %s17_s16 = sshll.u32 %s769_s15, 4  ;;  %s28_s19 = sshll.u32 %s811_s1, 4  ;;  %s18_s16 = int_to_ptr.vmem [resolvable:$true] %s17_s16  ;;  %s29_s19 = int_to_ptr.hbm [resolvable:$true] %s28_s19 }
   0x4   :  { %s770_s20 = smov 192   ;;  %s771_s21 = smov 12  }
   0x5   :  { %23 = dma.hbm_to_vmem [thread:$0]  %s16_s14, 1536, %s18_s16, [#allocation4], %s770_s20, %s770_s20, %s771_s21  }
   0x6   :  { %s772_s22 = smov [#allocation6]   ;;  %s773_s24 = smov 64  }
   0x7   :  { %s30_s23 = sshll.u32 %s772_s22, 4  ;;  %s774_s25 = smov 4   ;;  %s31_s23 = int_to_ptr.vmem [resolvable:$true] %s30_s23 }
   0x8   :  { %36 = dma.hbm_to_vmem [thread:$0]  %s29_s19, 3072, %s31_s23, [#allocation7], %s773_s24, %s773_s24, %s774_s25  }
   0x9   :  { %763 = dma.done.wait [#allocation4], 1536  }
   0xa   :  { %764 = vsyncadd [#allocation4], 4294965760 }
   0xb   :  { %765 = dma.done.wait [#allocation7], 3072  }
   0xc   :  { %766 = vsyncadd [#allocation7], 4294964224  ;;  %v656_v0 = vld [vmem:[#allocation6 + $0x38] sm:$0xff]  ;;  %v655_v3 = vld [vmem:[#allocation6 + $0x30] sm:$0xff]  ;;  %s479_s29 = sshll.u32 %s813_s3, 4  ;;  %s776_s30 = smov 128   ;;  %s480_s29 = int_to_ptr.hbm [resolvable:$true] %s479_s29 }
   0xd   :  { %v664_v1 = vld [vmem:[#allocation6 + $0x78] sm:$0xff]  ;;  %339 = vmatpush.bf16.msra.mxu0 %v656_v0  ;;  %v663_v4 = vld [vmem:[#allocation6 + $0x70] sm:$0xff]  ;;  %673 = vmatpush.bf16.msra.mxu3 %v656_v0  ;;  %v654_v6 = vld [vmem:[#allocation6 + $0x28] sm:$0xff]  ;;  %s777_s4 = smov 8  }
   0xe   :  { %v672_v2 = vld [vmem:[#allocation6 + $0xb8] sm:$0xff]  ;;  %368 = vmatpush.bf16.msra.mxu1 %v664_v1  ;;  %v671_v5 = vld [vmem:[#allocation6 + $0xb0] sm:$0xff]  ;;  %v662_v7 = vld [vmem:[#allocation6 + $0x68] sm:$0xff] }
   0xf   :  { %397 = vmatpush.bf16.msra.mxu2 %v672_v2  ;;  %v670_v8 = vld [vmem:[#allocation6 + $0xa8] sm:$0xff]  ;;  %v653_v9 = vld [vmem:[#allocation6 + $0x20] sm:$0xff]  ;;  %v652_v12 = vld [vmem:[#allocation6 + $0x18] sm:$0xff] }
  0x10   :  { %v661_v10 = vld [vmem:[#allocation6 + $0x60] sm:$0xff]  ;;  %v660_v13 = vld [vmem:[#allocation6 + $0x58] sm:$0xff]  ;;  %v651_v15 = vld [vmem:[#allocation6 + $0x10] sm:$0xff] }
  0x11   :  { %340 = vmatpush.bf16.msra.mxu0 %v655_v3  ;;  %674 = vmatpush.bf16.msra.mxu3 %v655_v3  ;;  %v669_v11 = vld [vmem:[#allocation6 + $0xa0] sm:$0xff]  ;;  %v668_v14 = vld [vmem:[#allocation6 + $0x98] sm:$0xff]  ;;  %v659_v16 = vld [vmem:[#allocation6 + $0x50] sm:$0xff] }
  0x12   :  { %369 = vmatpush.bf16.msra.mxu1 %v663_v4  ;;  %v667_v17 = vld [vmem:[#allocation6 + $0x90] sm:$0xff]  ;;  %v650_v18 = vld [vmem:[#allocation6 + $0x8] sm:$0xff]  ;;  %v649_v21 = vld [vmem:[#allocation6] sm:$0xff] }
  0x13   :  { %398 = vmatpush.bf16.msra.mxu2 %v671_v5  ;;  %v658_v19 = vld [vmem:[#allocation6 + $0x48] sm:$0xff]  ;;  %v657_v22 = vld [vmem:[#allocation6 + $0x40] sm:$0xff]  ;;  %v497_v27 = vld [vmem:[#allocation3 + $0xc] sm:$0xf0] }
  0x14   :  { %v666_v20 = vld [vmem:[#allocation6 + $0x88] sm:$0xff]  ;;  %v665_v23 = vld [vmem:[#allocation6 + $0x80] sm:$0xff]  ;;  %v639_v29 = vld [vmem:[#allocation3 + $0x10] sm:$0xf0] }
  0x15   :  { %341 = vmatpush.bf16.msra.mxu0 %v654_v6  ;;  %675 = vmatpush.bf16.msra.mxu3 %v654_v6  ;;  %v495_v24 = vld [vmem:[#allocation3] sm:$0xf]  ;;  %v638_v25 = vld [vmem:[#allocation3 + $0x8] sm:$0xf0]  ;;  %v637_v26 = vld [vmem:[#allocation3 + $0x4] sm:$0xf] }
  0x16   :  { %370 = vmatpush.bf16.msra.mxu1 %v662_v7  ;;  %v503_v28 = vld [vmem:[#allocation3 + $0x8] sm:$0xf]  ;;  %v507_v30 = vld [vmem:[#allocation3 + $0x18] sm:$0xf]  ;;  %v641_v31 = vld [vmem:[#allocation3 + $0x20] sm:$0xf0]  ;;  %v496_v32 = vor.u32 %v638_v25, %v495_v24  ;;  %v500_v33 = vor.u32 %v637_v26, %v497_v27 }
  0x17   :  { %399 = vmatpush.bf16.msra.mxu2 %v670_v8  ;;  %v504_v34 = vor.u32 %v639_v29, %v503_v28  ;;  %v508_v35 = vor.u32 %v641_v31, %v507_v30  ;;  %v640_v36 = vld [vmem:[#allocation3 + $0x1c] sm:$0xf]  ;;  %v509_v37 = vld [vmem:[#allocation3 + $0x24] sm:$0xf0]  ;;  %v515_v38 = vld [vmem:[#allocation3 + $0x20] sm:$0xf] }
  0x18   :  { %v642_v39 = vld [vmem:[#allocation3 + $0x28] sm:$0xf0]  ;;  %v519_v40 = vld [vmem:[#allocation3 + $0x30] sm:$0xf]  ;;  %v644_v41 = vld [vmem:[#allocation3 + $0x38] sm:$0xf0]  ;;  %v512_v42 = vor.u32 %v640_v36, %v509_v37 }
  0x19   :  { %342 = vmatpush.bf16.msra.mxu0 %v653_v9  ;;  %676 = vmatpush.bf16.msra.mxu3 %v653_v9  ;;  %v516_v43 = vor.u32 %v642_v39, %v515_v38  ;;  %v520_v44 = vor.u32 %v644_v41, %v519_v40  ;;  %v643_v45 = vld [vmem:[#allocation3 + $0x34] sm:$0xf]  ;;  %v521_v46 = vld [vmem:[#allocation3 + $0x3c] sm:$0xf0]  ;;  %v527_v47 = vld [vmem:[#allocation3 + $0x38] sm:$0xf] }
  0x1a   :  { %371 = vmatpush.bf16.msra.mxu1 %v661_v10  ;;  %v645_v48 = vld [vmem:[#allocation3 + $0x40] sm:$0xf0]  ;;  %v531_v49 = vld [vmem:[#allocation3 + $0x48] sm:$0xf]  ;;  %v647_v50 = vld [vmem:[#allocation3 + $0x50] sm:$0xf0]  ;;  %v524_v51 = vor.u32 %v643_v45, %v521_v46 }
  0x1b   :  { %400 = vmatpush.bf16.msra.mxu2 %v669_v11  ;;  %v528_v52 = vor.u32 %v645_v48, %v527_v47  ;;  %v532_v53 = vor.u32 %v647_v50, %v531_v49  ;;  %v646_v54 = vld [vmem:[#allocation3 + $0x4c] sm:$0xf]  ;;  %v533_v55 = vld [vmem:[#allocation3 + $0x54] sm:$0xf0]  ;;  %v539_v56 = vld [vmem:[#allocation3 + $0x50] sm:$0xf] }
  0x1c   :  { %v648_v57 = vld [vmem:[#allocation3 + $0x58] sm:$0xf0]  ;;  %v536_v58 = vor.u32 %v646_v54, %v533_v55  ;;  %v690_v63 = vld [vmem:[%s812_s2] ss:$0 sm:$0xff]  ;;  %s775_s2 = smov [#allocation8]  }
  0x1d   :  { %343 = vmatpush.bf16.msra.mxu0 %v652_v12  ;;  %677 = vmatpush.bf16.msra.mxu3 %v652_v12  ;;  %v540_v59 = vor.u32 %v648_v57, %v539_v56  ;;  %s477_s26 = sshll.u32 %s775_s2, 4  ;;  %s478_s26 = int_to_ptr.vmem [resolvable:$true] %s477_s26 }
  0x1e   :  { %372 = vmatpush.bf16.msra.mxu1 %v660_v13 }
  0x1f   :  { %401 = vmatpush.bf16.msra.mxu2 %v668_v14 }
  0x21   :  { %344 = vmatpush.bf16.msra.mxu0 %v651_v15  ;;  %678 = vmatpush.bf16.msra.mxu3 %v651_v15 }
  0x22   :  { %373 = vmatpush.bf16.msra.mxu1 %v659_v16 }
  0x23   :  { %402 = vmatpush.bf16.msra.mxu2 %v667_v17 }
  0x25   :  { %345 = vmatpush.bf16.msra.mxu0 %v650_v18  ;;  %679 = vmatpush.bf16.msra.mxu3 %v650_v18 }
  0x26   :  { %374 = vmatpush.bf16.msra.mxu1 %v658_v19 }
  0x27   :  { %403 = vmatpush.bf16.msra.mxu2 %v666_v20 }
  0x29   :  { %346 = vmatpush.bf16.msra.mxu0 %v649_v21  ;;  %680 = vmatpush.bf16.msra.mxu3 %v649_v21 }
  0x2a   :  { %375 = vmatpush.bf16.msra.mxu1 %v657_v22 }
  0x2b   :  { %404 = vmatpush.bf16.msra.mxu2 %v665_v23 }
  0x2c   :  { %347 = vmatmul.bf16.vlgmr.msra.gmra.mxu0 %v496_v32  ;;  %352 = vmatmul.bf16.vlgmr.msra.gmra.mxu3 %v508_v35 }
  0x2d   :  { %376 = vmatmul.bf16.vlgmr.msra.gmra.mxu1 %v500_v33 }
  0x2e   :  { %405 = vmatmul.bf16.vlgmr.msra.gmra.mxu2 %v504_v34 }
  0x3c   :  { %357 = vmatmul.bf16.gmra.mxu3 %v520_v44 }
  0x3d   :  { %381 = vmatmul.bf16.gmra.mxu1 %v512_v42 }
  0x3e   :  { %410 = vmatmul.bf16.gmra.mxu2 %v516_v43 }
  0x4c   :  { %362 = vmatmul.bf16.gmra.mxu3 %v532_v53 }
  0x4d   :  { %386 = vmatmul.bf16.gmra.mxu1 %v524_v51 }
  0x4e   :  { %415 = vmatmul.bf16.gmra.mxu2 %v528_v52 }
  0x5d   :  { %391 = vmatmul.bf16.gmra.mxu1 %v536_v58 }
  0x5e   :  { %420 = vmatmul.bf16.gmra.mxu2 %v540_v59 }
  0xa9   :  { %v348_v61 = vpop.f32.mrf.mxu0 }
  0xaa   :  { %v377_v60 = vpop.f32.mrf.mxu1 }
  0xab   :  { %v378_v62 = vadd.f32 %v377_v60, %v348_v61 }
  0xaf   :  { %v353_v5 = vpop.f32.mrf.mxu3 }
  0xb1   :  { %v406_v0 = vpop.f32.mrf.mxu2  ;;  %v350_v4 = vpop.f32.mrf.mxu0 }
  0xb2   :  { %v407_v1 = vadd.f32 %v406_v0, %v378_v62  ;;  %v379_v2 = vpop.f32.mrf.mxu1 }
  0xb3   :  { %v380_v6 = vadd.f32 %v379_v2, %v350_v4 }
  0xb4   :  { %v457_v3 = vadd.f32 %v690_v63, %v407_v1 }
  0xb6   :  { %465 = vst [vmem:[#allocation8] sm:$0xff] %v457_v3 }
  0xb7   :  { %v355_v12 = vpop.f32.mrf.mxu3 }
  0xb9   :  { %v408_v7 = vpop.f32.mrf.mxu2 }
  0xba   :  { %v409_v8 = vadd.f32 %v408_v7, %v380_v6  ;;  %v382_v9 = vpop.f32.mrf.mxu1 }
  0xbb   :  { %v383_v11 = vadd.f32 %v382_v9, %v353_v5 }
  0xbc   :  { %v458_v10 = vadd.f32 %v690_v63, %v409_v8 }
  0xbe   :  { %466 = vst [vmem:[#allocation8 + $0x8] sm:$0xff] %v458_v10 }
  0xbf   :  { %v358_v18 = vpop.f32.mrf.mxu3 }
  0xc1   :  { %v411_v13 = vpop.f32.mrf.mxu2 }
  0xc2   :  { %v412_v14 = vadd.f32 %v411_v13, %v383_v11  ;;  %v384_v15 = vpop.f32.mrf.mxu1 }
  0xc3   :  { %v385_v17 = vadd.f32 %v384_v15, %v355_v12 }
  0xc4   :  { %v459_v16 = vadd.f32 %v690_v63, %v412_v14 }
  0xc6   :  { %467 = vst [vmem:[#allocation8 + $0x10] sm:$0xff] %v459_v16 }
  0xc7   :  { %v360_v27 = vpop.f32.mrf.mxu3 }
  0xc9   :  { %v413_v19 = vpop.f32.mrf.mxu2 }
  0xca   :  { %v414_v20 = vadd.f32 %v413_v19, %v385_v17  ;;  %v387_v21 = vpop.f32.mrf.mxu1 }
  0xcb   :  { %v388_v23 = vadd.f32 %v387_v21, %v358_v18 }
  0xcc   :  { %v460_v22 = vadd.f32 %v690_v63, %v414_v20 }
  0xce   :  { %468 = vst [vmem:[#allocation8 + $0x18] sm:$0xff] %v460_v22 }
  0xcf   :  { %v363_v34 = vpop.f32.mrf.mxu3 }
  0xd1   :  { %v416_v24 = vpop.f32.mrf.mxu2 }
  0xd2   :  { %v417_v25 = vadd.f32 %v416_v24, %v388_v23  ;;  %v389_v26 = vpop.f32.mrf.mxu1 }
  0xd3   :  { %v390_v29 = vadd.f32 %v389_v26, %v360_v27 }
  0xd4   :  { %v461_v28 = vadd.f32 %v690_v63, %v417_v25 }
  0xd6   :  { %469 = vst [vmem:[#allocation8 + $0x20] sm:$0xff] %v461_v28 }
  0xd7   :  { %v365_v40 = vpop.f32.mrf.mxu3 }
  0xd9   :  { %v418_v30 = vpop.f32.mrf.mxu2 }
  0xda   :  { %v419_v31 = vadd.f32 %v418_v30, %v390_v29  ;;  %v392_v32 = vpop.f32.mrf.mxu1 }
  0xdb   :  { %v393_v35 = vadd.f32 %v392_v32, %v363_v34 }
  0xdc   :  { %v462_v33 = vadd.f32 %v690_v63, %v419_v31 }
  0xde   :  { %470 = vst [vmem:[#allocation8 + $0x28] sm:$0xff] %v462_v33 }
  0xe1   :  { %v421_v36 = vpop.f32.mrf.mxu2 }
  0xe2   :  { %v422_v37 = vadd.f32 %v421_v36, %v393_v35  ;;  %v394_v39 = vpop.f32.mrf.mxu1 }
  0xe3   :  { %v395_v41 = vadd.f32 %v394_v39, %v365_v40 }
  0xe4   :  { %v463_v38 = vadd.f32 %v690_v63, %v422_v37 }
  0xe6   :  { %471 = vst [vmem:[#allocation8 + $0x30] sm:$0xff] %v463_v38 }
  0xe9   :  { %v423_v42 = vpop.f32.mrf.mxu2 }
  0xea   :  { %v424_v43 = vadd.f32 %v423_v42, %v395_v41 }
  0xec   :  { %v464_v44 = vadd.f32 %v690_v63, %v424_v43 }
  0xee   :  { %472 = vst [vmem:[#allocation8 + $0x38] sm:$0xff] %v464_v44 }
  0xef   :  { %485 = dma.vmem_to_hbm [thread:$0]  %s478_s26, 1024, %s480_s29, [#allocation5], %s776_s30, %s776_s30, %s777_s4  }
  0xf0   :  { %767 = dma.done.wait [#allocation5], 1024  }
  0xf1   :  { %768 = vsyncadd [#allocation5], 4294966272 }
  0xf2   :  { %490 = vsyncpa [#allocation4], 1 }
  0xf3   :  { %491 = vsyncpa [#allocation7], 1 }
  0xf4   :  { %492 = vsyncpa [#allocation5], 1 }

</bundles_post_ra>
